<compile_context>
chip_gen: v7x
topology: tpu7x:2x2x1
jax: 0.10.0
libtpu: 0.0.40
codegen_flags: <defaults>
</compile_context>

<pallas_src>
import functools

import jax
import jax.numpy as jnp
from jax.experimental import pallas as pl
from jax.experimental.pallas import tpu as pltpu


def ngcf_kernel(adj_ref, hsrc_ref, hdst_ref, w1_ref, w2_ref, out_ref, acc_ref, *,
                deg_col):
    """Grid: (dst-node tile i [parallel], src-node tile k [reduction, last])."""
    k = pl.program_id(1)

    @pl.when(k == 0)
    def _init():
        acc_ref[...] = jnp.zeros_like(acc_ref)

    # Neighbor aggregation (and in-degree via the ones lane): MXU, f32 accumulation.
    a = adj_ref[...].astype(jnp.bfloat16)   # no-op when adjacency is stored in bf16
    acc_ref[...] += jnp.dot(a, hsrc_ref[...], preferred_element_type=jnp.float32)

    @pl.when(k == pl.num_programs(1) - 1)
    def _finalize():
        copy_sum = acc_ref[...]                               # (tile_n, fpad) f32
        h_i = hdst_ref[...].astype(jnp.float32)               # (tile_n, fpad)
        inner_sum = h_i * copy_sum                            # NGCF inner-product term
        # Padded weight rows (>= Fin, incl. the degree lane) are zero -> no leakage.
        rst = (jnp.dot(copy_sum, w1_ref[...], preferred_element_type=jnp.float32)
               + jnp.dot(inner_sum, w2_ref[...], preferred_element_type=jnp.float32))
        in_deg = copy_sum[:, deg_col:deg_col + 1]             # accumulated by ones lane
        norm = jax.lax.rsqrt(jnp.maximum(in_deg, 1.0))        # indeg^{-1/2}, clamp(min=1)
        out_ref[...] = (rst * norm).astype(out_ref.dtype)


def ngcf_conv(adj, feat, w1, w2, *, tile_n=512, tile_k=1024):
    """Pallas NGCF_Conv forward (norm='both', weight=True, bias=False, no activation).

    adj : (N, N) 0/1 adjacency, adj[i, j] = 1 iff edge j -> i. Any float dtype;
          storing it in bf16 persistently halves the dominant HBM stream.
    feat: (N, Fin).  w1, w2: (Fin, Fout).  Returns (N, Fout) float32.
    """
    N, Fin = feat.shape
    Fout = w1.shape[1]
    assert adj.shape == (N, N)

    tile_n = min(tile_n, N)
    tile_k = min(tile_k, N)
    # Keep >= 2 dst tiles so the "parallel" axis can shard across TensorCores (v7x).
    while N // tile_n < 2 and tile_n > 8 and tile_n % 2 == 0:
        tile_n //= 2
    assert N % tile_n == 0 and N % tile_k == 0, "N must be divisible by the tile sizes"

    # Source-side normalization h = feat * outdeg^{-1/2}, computed once (grid-invariant).
    out_deg = jnp.maximum(jnp.sum(adj, axis=0, dtype=jnp.float32), 1.0)
    h = feat.astype(jnp.float32) * jax.lax.rsqrt(out_deg)[:, None]

    # Pad Fin up to a multiple of 128 (lane-dense blocks / accumulator).  The first pad
    # lane is all-ones so the A @ h matmul accumulates the in-degree in that lane for
    # free; the corresponding weight rows are zero so it never leaks into the output.
    fpad = -(-(Fin + 1) // 128) * 128
    deg_col = Fin
    h_pad = jnp.concatenate(
        [h,
         jnp.ones((N, 1), jnp.float32),
         jnp.zeros((N, fpad - Fin - 1), jnp.float32)], axis=1)
    h_bf16 = h_pad.astype(jnp.bfloat16)

    # Zero-pad the weight K rows (small, kept f32: the finalize GEMM is off the hot path).
    w1p = jnp.pad(w1.astype(jnp.float32), ((0, fpad - Fin), (0, 0)))
    w2p = jnp.pad(w2.astype(jnp.float32), ((0, fpad - Fin), (0, 0)))

    grid = (N // tile_n, N // tile_k)

    # VMEM budget: double-buffered inputs/outputs + the f32 accumulator, with headroom.
    adj_bytes = adj.dtype.itemsize
    vmem_est = (2 * tile_n * tile_k * adj_bytes            # adjacency double buffer
                + 2 * (tile_k + tile_n) * fpad * 2         # hsrc / hdst (bf16)
                + 2 * 2 * fpad * Fout * 4                  # weights
                + 2 * tile_n * Fout * 4                    # output
                + tile_n * fpad * 4)                       # accumulator scratch
    vmem_limit = int(min(48 * 1024 * 1024, max(16 * 1024 * 1024, 2 * vmem_est)))

    kernel = functools.partial(ngcf_kernel, deg_col=deg_col)

    return pl.pallas_call(
        kernel,
        out_shape=jax.ShapeDtypeStruct((N, Fout), jnp.float32),
        grid_spec=pltpu.PrefetchScalarGridSpec(
            num_scalar_prefetch=0,
            grid=grid,
            in_specs=[
                # adjacency block for (dst tile i, src tile k) -- the dominant stream
                pl.BlockSpec((tile_n, tile_k), lambda i, k: (i, k)),
                # normalized+padded features of the src tile k
                pl.BlockSpec((tile_k, fpad), lambda i, k: (k, 0)),
                # normalized+padded features of the dst tile i (inner-product term)
                pl.BlockSpec((tile_n, fpad), lambda i, k: (i, 0)),
                # padded weights
                pl.BlockSpec((fpad, Fout), lambda i, k: (0, 0)),
                pl.BlockSpec((fpad, Fout), lambda i, k: (0, 0)),
            ],
            out_specs=pl.BlockSpec((tile_n, Fout), lambda i, k: (i, 0)),
            scratch_shapes=[
                pltpu.VMEM((tile_n, fpad), jnp.float32),   # copy_sum (+indeg) accumulator
            ],
        ),
        compiler_params=pltpu.CompilerParams(
            dimension_semantics=("parallel", "arbitrary"),
            vmem_limit_bytes=vmem_limit,
        ),
    )(adj, h_bf16, h_bf16, w1p, w2p)


def ngcf_ref(adj, feat, w1, w2):
    """Plain-JAX f32 reference of the PyTorch forward."""
    adj = adj.astype(jnp.float32)
    out_deg = jnp.maximum(adj.sum(axis=0), 1.0)
    in_deg = jnp.maximum(adj.sum(axis=1), 1.0)
    h = feat * (out_deg ** -0.5)[:, None]
    copy_sum = adj @ h
    inner_sum = h * copy_sum
    rst = copy_sum @ w1 + inner_sum @ w2
    return rst * (in_deg ** -0.5)[:, None]


if __name__ == "__main__":
    N, Fin, Fout = 256, 64, 32
    key = jax.random.PRNGKey(0)
    k_adj, k_feat, k_w1, k_w2 = jax.random.split(key, 4)

    # Random directed graph + self loops (deterministic).  The adjacency is stored in
    # bf16 (0/1 exact) so the kernel streams it directly, without any wrapper cast.
    adj_f32 = jax.random.bernoulli(k_adj, 0.1, (N, N)).astype(jnp.float32)
    adj_f32 = jnp.maximum(adj_f32, jnp.eye(N, dtype=jnp.float32))
    adj = adj_f32.astype(jnp.bfloat16)

    feat = jax.random.normal(k_feat, (N, Fin), dtype=jnp.float32)

    # Xavier (Glorot) uniform init, bias=False as in the module defaults.
    limit = (6.0 / (Fin + Fout)) ** 0.5
    w1 = jax.random.uniform(k_w1, (Fin, Fout), jnp.float32, -limit, limit)
    w2 = jax.random.uniform(k_w2, (Fin, Fout), jnp.float32, -limit, limit)

    # Small tiles so the demo exercises both grid axes (grid = (2, 2)); production
    # defaults are 512 x 1024.
    out = jax.block_until_ready(ngcf_conv(adj, feat, w1, w2, tile_n=128, tile_k=128))
    ref = ngcf_ref(adj_f32, feat, w1, w2)
    assert out.shape == (N, Fout)
    # bf16 operands for the A@h matmul (f32 accumulation) -> relaxed tolerance.
    assert jnp.allclose(out, ref, rtol=2e-2, atol=2e-2), "mismatch vs reference"
    print("KERNEL_OK")
</pallas_src>

<mosaic_0001>
module attributes {stable_mosaic.version = 11 : i64} {
  func.func @ngcf_kernel(%arg0: i32, %arg1: i32, %arg2: memref<128x128xbf16, #tpu.memory_space<vmem>>, %arg3: memref<128x128xbf16, #tpu.memory_space<vmem>>, %arg4: memref<128x128xbf16, #tpu.memory_space<vmem>>, %arg5: memref<128x32xf32, #tpu.memory_space<vmem>>, %arg6: memref<128x32xf32, #tpu.memory_space<vmem>>, %arg7: memref<128x32xf32, #tpu.memory_space<vmem>>, %arg8: memref<128x128xf32, #tpu.memory_space<vmem>>) attributes {dimension_semantics = [#tpu.dimension_semantics<parallel>, #tpu.dimension_semantics<arbitrary>], iteration_bounds = array<i64: 2, 2>, scalar_prefetch = 0 : i64, scratch_operands = 1 : i64, tpu.core_type = #tpu.core_type<tc>, window_params = [{transform_indices = @transform_0, window_bounds = array<i64: 128, 128>}, {transform_indices = @transform_1, window_bounds = array<i64: 128, 128>}, {transform_indices = @transform_2, window_bounds = array<i64: 128, 128>}, {pipeline_mode = #tpu.pipeline_mode<synchronous>, transform_indices = @transform_3, window_bounds = array<i64: 128, 32>}, {pipeline_mode = #tpu.pipeline_mode<synchronous>, transform_indices = @transform_4, window_bounds = array<i64: 128, 32>}, {transform_indices = @transform_5, window_bounds = array<i64: 128, 32>}]} {
    %c0_i32 = arith.constant 0 : i32
    %0 = arith.cmpi eq, %arg1, %c0_i32 : i32
    %1 = arith.extui %0 : i1 to i32
    %c0_i32_0 = arith.constant 0 : i32
    %2 = arith.cmpi ne, %1, %c0_i32_0 : i32
    scf.if %2 {
      %cst_9 = arith.constant 0.000000e+00 : f32
      %12 = vector.broadcast %cst_9 : f32 to vector<128x128xf32>
      %c0_10 = arith.constant 0 : index
      %c0_11 = arith.constant 0 : index
      %13 = vector.load %arg8[%c0_10, %c0_11] : memref<128x128xf32, #tpu.memory_space<vmem>>, vector<128x128xf32>
      tpu.vector_store %arg8[%c0_10, %c0_11], %12 {strides = array<i32>} : memref<128x128xf32, #tpu.memory_space<vmem>>, vector<128x128xf32>,
    } else {
    }
    %c0 = arith.constant 0 : index
    %c0_1 = arith.constant 0 : index
    %3 = vector.load %arg2[%c0, %c0_1] : memref<128x128xbf16, #tpu.memory_space<vmem>>, vector<128x128xbf16>
    %c0_2 = arith.constant 0 : index
    %c0_3 = arith.constant 0 : index
    %4 = vector.load %arg8[%c0_2, %c0_3] : memref<128x128xf32, #tpu.memory_space<vmem>>, vector<128x128xf32>
    %c0_4 = arith.constant 0 : index
    %c0_5 = arith.constant 0 : index
    %5 = vector.load %arg3[%c0_4, %c0_5] : memref<128x128xbf16, #tpu.memory_space<vmem>>, vector<128x128xbf16>
    %cst = arith.constant dense<0.000000e+00> : vector<128x128xf32>
    %6 = tpu.matmul %3, %5, %cst {dimension_numbers = #tpu.dot_dimension_numbers<[1], [0], [0], [1], [0, 0, 1, 1], [], []>} : vector<128x128xbf16>, vector<128x128xbf16>, vector<128x128xf32> -> vector<128x128xf32>
    %7 = arith.addf %4, %6 : vector<128x128xf32>
    %c0_6 = arith.constant 0 : index
    %c0_7 = arith.constant 0 : index
    %8 = vector.load %arg8[%c0_6, %c0_7] : memref<128x128xf32, #tpu.memory_space<vmem>>, vector<128x128xf32>
    tpu.vector_store %arg8[%c0_6, %c0_7], %7 {strides = array<i32>} : memref<128x128xf32, #tpu.memory_space<vmem>>, vector<128x128xf32>,
    %c1_i32 = arith.constant 1 : i32
    %9 = arith.cmpi eq, %arg1, %c1_i32 : i32
    %10 = arith.extui %9 : i1 to i32
    %c0_i32_8 = arith.constant 0 : i32
    %11 = arith.cmpi ne, %10, %c0_i32_8 : i32
    scf.if %11 {
      %c0_9 = arith.constant 0 : index
      %c0_10 = arith.constant 0 : index
      %12 = vector.load %arg8[%c0_9, %c0_10] : memref<128x128xf32, #tpu.memory_space<vmem>>, vector<128x128xf32>
      %c0_11 = arith.constant 0 : index
      %c0_12 = arith.constant 0 : index
      %13 = vector.load %arg4[%c0_11, %c0_12] : memref<128x128xbf16, #tpu.memory_space<vmem>>, vector<128x128xbf16>
      %14 = arith.extf %13 : vector<128x128xbf16> to vector<128x128xf32>
      %15 = arith.mulf %14, %12 : vector<128x128xf32>
      %c0_13 = arith.constant 0 : index
      %c0_14 = arith.constant 0 : index
      %16 = vector.load %arg5[%c0_13, %c0_14] : memref<128x32xf32, #tpu.memory_space<vmem>>, vector<128x32xf32>
      %cst_15 = arith.constant dense<0.000000e+00> : vector<128x32xf32>
      %17 = tpu.matmul %12, %16, %cst_15 {dimension_numbers = #tpu.dot_dimension_numbers<[1], [0], [0], [1], [0, 0, 1, 1], [], []>} : vector<128x128xf32>, vector<128x32xf32>, vector<128x32xf32> -> vector<128x32xf32>
      %c0_16 = arith.constant 0 : index
      %c0_17 = arith.constant 0 : index
      %18 = vector.load %arg6[%c0_16, %c0_17] : memref<128x32xf32, #tpu.memory_space<vmem>>, vector<128x32xf32>
      %cst_18 = arith.constant dense<0.000000e+00> : vector<128x32xf32>
      %19 = tpu.matmul %15, %18, %cst_18 {dimension_numbers = #tpu.dot_dimension_numbers<[1], [0], [0], [1], [0, 0, 1, 1], [], []>} : vector<128x128xf32>, vector<128x32xf32>, vector<128x32xf32> -> vector<128x32xf32>
      %20 = arith.addf %17, %19 : vector<128x32xf32>
      %21 = vector.extract_strided_slice %12 {offsets = [0, 64], sizes = [128, 1], strides = [1, 1]} : vector<128x128xf32> to vector<128x1xf32>
      %cst_19 = arith.constant 1.000000e+00 : f32
      %22 = vector.broadcast %cst_19 : f32 to vector<128x1xf32>
      %23 = arith.maximumf %21, %22 : vector<128x1xf32>
      %24 = math.rsqrt %23 : vector<128x1xf32>
      %25 = vector.broadcast %24 : vector<128x1xf32> to vector<128x32xf32>
      %26 = arith.mulf %20, %25 : vector<128x32xf32>
      %c0_20 = arith.constant 0 : index
      %c0_21 = arith.constant 0 : index
      %27 = vector.load %arg7[%c0_20, %c0_21] : memref<128x32xf32, #tpu.memory_space<vmem>>, vector<128x32xf32>
      tpu.vector_store %arg7[%c0_20, %c0_21], %26 {strides = array<i32>} : memref<128x32xf32, #tpu.memory_space<vmem>>, vector<128x32xf32>,
    } else {
    }
    return
  }
  func.func @transform_0(%arg0: i32, %arg1: i32) -> (i32, i32) {
    %c0_i32 = arith.constant 0 : i32
    return %arg0, %arg1 : i32, i32
  }
  func.func @transform_1(%arg0: i32, %arg1: i32) -> (i32, i32) {
    %c0_i32 = arith.constant 0 : i32
    %c0_i32_0 = arith.constant 0 : i32
    return %arg1, %c0_i32 : i32, i32
  }
  func.func @transform_2(%arg0: i32, %arg1: i32) -> (i32, i32) {
    %c0_i32 = arith.constant 0 : i32
    %c0_i32_0 = arith.constant 0 : i32
    return %arg0, %c0_i32 : i32, i32
  }
  func.func @transform_3(%arg0: i32, %arg1: i32) -> (i32, i32) {
    %c0_i32 = arith.constant 0 : i32
    %c0_i32_0 = arith.constant 0 : i32
    %c0_i32_1 = arith.constant 0 : i32
    return %c0_i32, %c0_i32_0 : i32, i32
  }
  func.func @transform_4(%arg0: i32, %arg1: i32) -> (i32, i32) {
    %c0_i32 = arith.constant 0 : i32
    %c0_i32_0 = arith.constant 0 : i32
    %c0_i32_1 = arith.constant 0 : i32
    return %c0_i32, %c0_i32_0 : i32, i32
  }
  func.func @transform_5(%arg0: i32, %arg1: i32) -> (i32, i32) {
    %c0_i32 = arith.constant 0 : i32
    %c0_i32_0 = arith.constant 0 : i32
    return %arg0, %c0_i32 : i32, i32
  }
}

</mosaic_0001>

<bundles_post_ra>
// kernel: tpu_custom_call.1
= control target key start
LH: loop header
LB: loop body
LE: loop exit
PB: predicated region body
PF: predicated region fallthrough
CT: control target
= control target key end

     0   :  { %s2674_s0 = inlined_call_operand.vmem [shape: bf16[256,256], index: 0, kind: input, shape index: {}]   ;;  %s2675_s1 = inlined_call_operand.hbm [shape: bf16[256,128], index: 1, kind: input, shape index: {}]   ;;  %s2676_s2 = inlined_call_operand.hbm [shape: bf16[256,128], index: 2, kind: input, shape index: {}]   ;;  %s2677_s3 = inlined_call_operand.vmem [shape: f32[128,32], index: 3, kind: input, shape index: {}]   ;;  %s2678_s4 = inlined_call_operand.vmem [shape: f32[128,32], index: 4, kind: input, shape index: {}]   ;;  %s2679_s5 = inlined_call_operand.vmem [shape: f32[256,32], index: 5, kind: output, shape index: {}]  }
   0x1   :  { %2687 = sst [smem:[#allocation17_spill]] %s2674_s0 }
   0x2   :  { %2688 = sst [smem:[#allocation18_spill]] %s2675_s1 }
   0x3   :  { %10 = vsyncpa [#allocation5], 0 }
   0x4   :  { %12 = vsyncpa [#allocation5 + $0x1], 0 }
   0x5   :  { %13 = vsyncpa [#allocation7], 0 }
   0x6   :  { %15 = vsyncpa [#allocation7 + $0x1], 0  ;;  %s2146_s18 = smov 0   ;;  %s2148_s19 = smov 0  }
   0x7   :  { %s2150_s20 = smov 0   ;;  %s2152_s21 = smov 0  }
   0x8   :  { %s2154_s22 = smov 0   ;;  %s2156_s23 = smov 0  }
   0x9   :  { %s2158_s24 = smov 0   ;;  %s2160_s25 = smov 0  }
   0xa   :  { %s2162_s26 = smov 0   ;;  %s2164_s27 = smov 0  }
   0xb   :  { %s2166_s28 = smov 0   ;;  %s2168_s29 = smov 0  }
   0xc   :  { %s2170_s30 = smov 0  }
   0xd LB: > { %2689 = sst [smem:[#allocation10_spill]] %s2080_s23  ;;  %s1378_s6 = sadd.s32 4294967295, %s2108_s30   ;;  %s2108_s30 = sphi %s2170_s30, %s21_s30   ;;  %s2104_s29 = sphi %s2168_s29, %s2721_s29   ;;  %s2100_s28 = sphi %s2166_s28, %s2720_s28   ;;  %s2096_s27 = sphi %s2164_s27, %s2719_s27   ;;  %s2092_s26 = sphi %s2162_s26, %s2710_s26   ;;  %s2088_s25 = sphi %s2160_s25, %s2709_s25   ;;  %s2084_s24 = sphi %s2158_s24, %s2708_s24   ;;  %s2080_s23 = sphi %s2156_s23, %s2707_s23   ;;  %s2076_s22 = sphi %s2154_s22, %s2718_s22   ;;  %s2072_s21 = sphi %s2152_s21, %s2717_s21   ;;  %s2068_s20 = sphi %s2150_s20, %s2716_s20   ;;  %s2064_s19 = sphi %s2148_s19, %s2715_s19   ;;  %s2060_s18 = sphi %s2146_s18, %s2714_s18  }
   0xe   : > { %2690 = sst [smem:[#allocation11_spill]] %s2088_s25  ;;  %s30_s7 = sadd.s32 1, %s2100_s28 }
   0xf   : > { %2691 = sst [smem:[#allocation12_spill]] %s2100_s28  ;;  %p31_p0 = scmp.ge.s32.totalorder %s30_s7, 2 }
  0x10   : > { %s33_s8 = sadd.s32 1, %s2104_s29  ;;  %s42_s9 = sadd.s32 1, %s2088_s25 }
  0x11   : > { %p49_p1 = scmp.ne.s32.totalorder %s2088_s25, %s2084_s24  ;;  %s2723_s7 = smov (%p31_p0, %s30_s7), 0 }
  0x12   : > { %2692 = sst [smem:[#allocation13_spill]] %s2723_s7  ;;  %s2725_s8 = smov (!%p31_p0, %s33_s8), %s2104_s29 }
  0x13   : > { %s38_s10 = ssub.s32 %s2100_s28, %s2723_s7  ;;  %p50_p2 = scmp.eq.s32.totalorder %s2108_s30, 0 }
  0x14   : > { %p35_p3 = scmp.ge.s32.totalorder %s2725_s8, 2  ;;  %p66_p4 = scmp.eq.s32.totalorder %s38_s10, 0 }
  0x15   : > { %p2225_p5 = por %p50_p2, %p49_p1  ;;  %s68_s12 = sadd.s32 1, %s2080_s23 }
  0x16   : > { %s2727_s8 = smov (%p35_p3, %s2725_s8), 0  ;;  %p75_p6 = scmp.ne.s32.totalorder %s2080_s23, %s2076_s22 }
  0x17   : > { %2694 = sst [smem:[#allocation14_spill]] %s2727_s8  ;;  %s37_s14 = ssub.s32 %s2104_s29, %s2727_s8 }
  0x18   : > { %s2233_s13 = scalar_select %p66_p4, %s2080_s23, %s68_s12  }
  0x19   : > { %s39_s15 = sor.u32 %s38_s10, %s37_s14  ;;  %p81_p7 = scmp.ne.s32.totalorder %s2076_s22, %s2072_s21 }
  0x1a   : > { %2695 = sst [smem:[#allocation15_spill]] %s2233_s13  ;;  %p40_p8 = scmp.eq.s32.totalorder %s39_s15, 0 }
  0x1b   : > { %p2243_p9 = por %p75_p6, %p50_p2  ;;  %p82_p10 = scmp.eq.s32.totalorder %s1378_s6, 0 }
  0x1c   : > { %p92_p11 = scmp.eq.s32.totalorder %s37_s14, 0  ;;  %s94_s12 = sadd.s32 1, %s2068_s20 }
  0x1d   : > { %s2248_s17 = scalar_select %p40_p8, %s2088_s25, %s42_s9  }
  0x1e   : > { %p2250_p12 = por %p82_p10, %p81_p7  ;;  %p101_p13 = scmp.ne.s32.totalorder %s2068_s20, %s2064_s19 }
  0x1f   : > { %2697 = sst [smem:[#allocation16_spill]] %s2248_s17  ;;  %p107_p0 = scmp.ne.s32.totalorder %s2064_s19, %s2060_s18 }
  0x20   : > { %s2698_s7 = scalar_select %p2250_p12, 1, 0 }
  0x21   : > { %s2256_s13 = scalar_select %p92_p11, %s2068_s20, %s94_s12  }
  0x22   : > { %p2264_p1 = por %p101_p13, %p50_p2  ;;  %p2268_p3 = por %p107_p0, %p82_p10 }
  0x23   : > { %p1381_p4 = scmp.ge.s32.totalorder %s2108_s30, 4 }
  0x24   : > { %s2700_s10 = scalar_select %p2268_p3, 1, 0 }
  0x25   : > { %201 = sbr.rel (%p1381_p4) target bundleno = 119 (0x77), region = 24 }
  0x2c   : > { %204 = sbr.rel (!%p2225_p5) target bundleno = 64 (0x40), region = 28  ;;  %s206_s6 = sand.u32 (%p2225_p5), 1, %s2088_s25  }
  0x2d   : > { %s1418_s18 = sshll.u32 (%p2225_p5), %s2104_s29, 5  ;;  %s1382_s9 = sshll.u32 (%p2225_p5), %s206_s6, 6 }
  0x2e   : > { %s211_s14 = sadd.s32 (%p2225_p5), %s2100_s28, %s1418_s18  ;;  %s2701_s0 = sld [smem:[#allocation17_spill]] (%p2225_p5) }
  0x2f   : > { %s1385_s15 = sshll.u32 (%p2225_p5), %s211_s14, 2  ;;  %s208_s11 = scalar_lea.vmem (%p2225_p5), [#allocation3], %s1382_s9 }
  0x34   : > { %s2281_s17 = scalar_lea.vmem %s2701_s0, %s1385_s15 }
  0x35   : > { %v229_v0 = vld [vmem:[%s2281_s17] sm:$0xf]  ;;  %v231_v1 = vld [vmem:[%s2281_s17 + $0x8] sm:$0xf]  ;;  %v233_v2 = vld [vmem:[%s2281_s17 + $0x10] sm:$0xf] }
  0x36   : > { %230 = vst [vmem:[%s208_s11] sm:$0xf] %v229_v0  ;;  %232 = vst [vmem:[%s208_s11 + $0x4] sm:$0xf] %v231_v1  ;;  %v235_v3 = vld [vmem:[%s2281_s17 + $0x18] sm:$0xf] }
  0x37   : > { %234 = vst [vmem:[%s208_s11 + $0x8] sm:$0xf] %v233_v2  ;;  %v237_v4 = vld [vmem:[%s2281_s17 + $0x20] sm:$0xf]  ;;  %v239_v5 = vld [vmem:[%s2281_s17 + $0x28] sm:$0xf] }
  0x38   : > { %236 = vst [vmem:[%s208_s11 + $0xc] sm:$0xf] %v235_v3  ;;  %238 = vst [vmem:[%s208_s11 + $0x10] sm:$0xf] %v237_v4  ;;  %v241_v6 = vld [vmem:[%s2281_s17 + $0x30] sm:$0xf] }
  0x39   : > { %240 = vst [vmem:[%s208_s11 + $0x14] sm:$0xf] %v239_v5  ;;  %v243_v7 = vld [vmem:[%s2281_s17 + $0x38] sm:$0xf]  ;;  %v245_v8 = vld [vmem:[%s2281_s17 + $0x40] sm:$0xf] }
  0x3a   : > { %242 = vst [vmem:[%s208_s11 + $0x18] sm:$0xf] %v241_v6  ;;  %244 = vst [vmem:[%s208_s11 + $0x1c] sm:$0xf] %v243_v7  ;;  %v247_v9 = vld [vmem:[%s2281_s17 + $0x48] sm:$0xf] }
  0x3b   : > { %246 = vst [vmem:[%s208_s11 + $0x20] sm:$0xf] %v245_v8  ;;  %v249_v10 = vld [vmem:[%s2281_s17 + $0x50] sm:$0xf]  ;;  %v251_v11 = vld [vmem:[%s2281_s17 + $0x58] sm:$0xf] }
  0x3c   : > { %248 = vst [vmem:[%s208_s11 + $0x24] sm:$0xf] %v247_v9  ;;  %250 = vst [vmem:[%s208_s11 + $0x28] sm:$0xf] %v249_v10  ;;  %v253_v12 = vld [vmem:[%s2281_s17 + $0x60] sm:$0xf] }
  0x3d   : > { %252 = vst [vmem:[%s208_s11 + $0x2c] sm:$0xf] %v251_v11  ;;  %v255_v13 = vld [vmem:[%s2281_s17 + $0x68] sm:$0xf]  ;;  %v257_v14 = vld [vmem:[%s2281_s17 + $0x70] sm:$0xf] }
  0x3e   : > { %254 = vst [vmem:[%s208_s11 + $0x30] sm:$0xf] %v253_v12  ;;  %256 = vst [vmem:[%s208_s11 + $0x34] sm:$0xf] %v255_v13  ;;  %v259_v15 = vld [vmem:[%s2281_s17 + $0x78] sm:$0xf] }
  0x3f   : > { %258 = vst [vmem:[%s208_s11 + $0x38] sm:$0xf] %v257_v14  ;;  %260 = vst [vmem:[%s208_s11 + $0x3c] sm:$0xf] %v259_v15 }
  0x40 PF: > { %s316_s8 = sand.u32 1, %s2080_s23   ;;  %s1419_s6 = sshll.u32 %s2100_s28, 10 }
  0x41   : > { %s1386_s18 = sshll.u32 %s316_s8, 6  ;;  %s2702_s1 = sld [smem:[#allocation18_spill]] }
  0x42   : > { %s320_s12 = scalar_lea.vmem [#allocation4], %s1386_s18  ;;  %s2308_s17 = scalar_lea.sflag [#allocation5], %s316_s8 }
  0x43   : > { %s327_s0 = sshll.u32 %s320_s12, 4  ;;  %s2306_s0 = int_to_ptr.vmem [resolvable:$true] %s327_s0 }
  0x47   : > { %s2304_s15 = scalar_lea.hbm %s2702_s1, %s1419_s6  ;;  %s1946_s6 = scalar_lea.hbm %s2702_s1, 2048 }
  0x48   : > { %s1942_s11 = scalar_lea.hbm %s2304_s15, 1024  ;;  %p1947_p7 = scmp.lt.u32.totalorder %s2304_s15, %s2702_s1 }
  0x49   : > { %p1943_p2 = scmp.ne.s32.totalorder %s2304_s15, %s1942_s11  ;;  %p1948_p8 = scmp.lt.u32.totalorder %s1946_s6, %s1942_s11 }
  0x4a   : > { %p1950_p11 = scmp.lt.u32.totalorder %s1942_s11, %s2304_s15 }
  0x4b   : > { %p1944_p5 = pnand %p1943_p2, %p2243_p9  ;;  %p1949_p10 = por %p1948_p8, %p1947_p7 }
  0x4d   : > { %p1945_p6 = pneg %p1944_p5  ;;  %p1951_p13 = por %p1950_p11, %p1949_p10 }
  0x4f   : > { %p1952_p0 = pnand %p1951_p13, %p1945_p6 }
  0x51   : > { %1955 = shalt.err (!%p1952_p0)
}
  0x52   : > { %s1956_s8 = scalar_lea.vmem %s2306_s0, 1024  ;;  %s2110_s25 = smov [#allocation4]  }
  0x53   : > { %p1957_p4 = scmp.ne.s32.totalorder %s2306_s0, %s1956_s8  ;;  %s1960_s28 = sshll.u32 %s2110_s25, 4  ;;  %s1961_s28 = int_to_ptr.vmem [resolvable:$false] %s1960_s28 }
  0x54   : > { %s1962_s18 = scalar_lea.vmem %s1961_s28, 2048  ;;  %p1963_p3 = scmp.lt.s32.totalorder %s2306_s0, %s1961_s28 }
  0x55   : > { %p1958_p2 = pnand %p1957_p4, %p2243_p9  ;;  %p1964_p12 = scmp.lt.s32.totalorder %s1962_s18, %s1956_s8 }
  0x57   : > { %p1959_p5 = pneg %p1958_p2  ;;  %p1965_p7 = por %p1964_p12, %p1963_p3 }
  0x59   : > { %p1966_p8 = pnand %p1965_p7, %p1959_p5 }
  0x5b   : > { %1969 = shalt.err (!%p1966_p8)
}
  0x5c   : > { %s2111_s12 = smov 64   ;;  %s2112_s11 = smov 4  }
  0x5d   : > { %1780 = dma.hbm_to_vmem [thread:$0]  (%p2243_p9), %s2304_s15, 1024, %s2306_s0, %s2308_s17, %s2111_s12, %s2111_s12, %s2112_s11  }
  0x5e   : > { %s337_s6 = sand.u32 1, %s2068_s20   ;;  %s1420_s9 = sshll.u32 %s2104_s29, 10 }
  0x5f   : > { %s1389_s14 = sshll.u32 %s337_s6, 6  ;;  %s2340_s28 = scalar_lea.hbm %s2676_s2, %s1420_s9 }
  0x60   : > { %s341_s18 = scalar_lea.vmem [#allocation6], %s1389_s14  ;;  %s2344_s16 = scalar_lea.sflag [#allocation7], %s337_s6 }
  0x61   : > { %s348_s1 = sshll.u32 %s341_s18, 4  ;;  %s1970_s23 = scalar_lea.hbm %s2340_s28, 1024  ;;  %s2342_s1 = int_to_ptr.vmem [resolvable:$true] %s348_s1 }
  0x62   : > { %p1971_p9 = scmp.ne.s32.totalorder %s2340_s28, %s1970_s23  ;;  %s1974_s17 = scalar_lea.hbm %s2676_s2, 2048 }
  0x63   : > { %p1975_p6 = scmp.lt.u32.totalorder %s2340_s28, %s2676_s2  ;;  %p1976_p10 = scmp.lt.u32.totalorder %s1974_s17, %s1970_s23 }
  0x64   : > { %p1972_p12 = pnand %p1971_p9, %p2264_p1  ;;  %p1978_p13 = scmp.lt.u32.totalorder %s1970_s23, %s2340_s28 }
  0x65   : > { %p1977_p11 = por %p1976_p10, %p1975_p6 }
  0x66   : > { %p1973_p3 = pneg %p1972_p12 }
  0x67   : > { %p1979_p0 = por %p1978_p13, %p1977_p11 }
  0x69   : > { %p1980_p4 = pnand %p1979_p0, %p1973_p3 }
  0x6b   : > { %1983 = shalt.err (!%p1980_p4)
}
  0x6c   : > { %s1984_s6 = scalar_lea.vmem %s2342_s1, 1024  ;;  %s2113_s14 = smov [#allocation6]  }
  0x6d   : > { %p1985_p2 = scmp.ne.s32.totalorder %s2342_s1, %s1984_s6  ;;  %s1988_s25 = sshll.u32 %s2113_s14, 4  ;;  %s1989_s25 = int_to_ptr.vmem [resolvable:$false] %s1988_s25 }
  0x6e   : > { %s1990_s18 = scalar_lea.vmem %s1989_s25, 2048  ;;  %p1991_p8 = scmp.lt.s32.totalorder %s2342_s1, %s1989_s25 }
  0x6f   : > { %p1986_p5 = pnand %p1985_p2, %p2264_p1  ;;  %p1992_p9 = scmp.lt.s32.totalorder %s1990_s18, %s1984_s6 }
  0x71   : > { %p1987_p7 = pneg %p1986_p5  ;;  %p1993_p12 = por %p1992_p9, %p1991_p8 }
  0x73   : > { %p1994_p6 = pnand %p1993_p12, %p1987_p7 }
  0x75   : > { %1997 = shalt.err (!%p1994_p6)
}
  0x76   : > { %1781 = dma.hbm_to_vmem [thread:$0]  (%p2264_p1), %s2340_s28, 1024, %s2342_s1, %s2344_s16, %s2111_s12, %s2111_s12, %s2112_s11  }
  0x77 PF: > { %p1392_p3 = scmp.ge.s32.totalorder %s2108_s30, 1  ;;  %p356_p10 = scmp.lt.s32.totalorder %s2108_s30, 5 }
  0x79   : > { %p357_p11 = pnand %p1392_p3, %p356_p10 }
  0x7a   : > { %s363_s23 = sand.u32 (!%p357_p11), 1, %s2084_s24   ;;  %s369_s0 = sand.u32 (!%p357_p11), 1, %s2076_s22  }
  0x7b   : > { %360 = sbr.rel (%p357_p11) target bundleno = 664 (0x298), region = 77  ;;  %s1393_s21 = sshll.u32 (!%p357_p11), %s363_s23, 6 }
  0x7c   : > { %s1394_s15 = sshll.u32 (!%p357_p11), %s369_s0, 6  ;;  %s2375_s17 = scalar_lea.vmem (!%p357_p11), [#allocation3], %s1393_s21 }
  0x7d   : > { %s370_s9 = scalar_lea.sflag (!%p357_p11), [#allocation5], %s369_s0  ;;  %s2377_s8 = scalar_lea.vmem (!%p357_p11), [#allocation4], %s1394_s15 }
  0x7e   : > { %p2703_p1 = scmp.ne.s32.totalorder (!%p357_p11), %s2698_s7, 0 }
  0x82   : > { %2051 = dma.done.wait (%p2703_p1), %s370_s9, 1024  }
  0x83   : > { %2053 = vsyncadd (%p2703_p1), %s370_s9, 4294966272  ;;  %s378_s1 = sand.u32 1, %s2064_s19   ;;  %p2704_p13 = scmp.ne.s32.totalorder %s2700_s10, 0 }
  0x84   : > { %s1395_s12 = sshll.u32 %s378_s1, 6  ;;  %s379_s11 = scalar_lea.sflag [#allocation7], %s378_s1 }
  0x85   : > { %s2384_s28 = scalar_lea.vmem [#allocation6], %s1395_s12 }
  0x86   : > { %2055 = dma.done.wait (%p2704_p13), %s379_s11, 1024  }
  0x87   : > { %2057 = vsyncadd (%p2704_p13), %s379_s11, 4294966272  ;;  %s1396_s24 = sshll.u32 %s2096_s27, 4  ;;  %p1398_p4 = scmp.ne.s32.totalorder %s2092_s26, 0 }
  0x88   : > { %p422_p0 = scmp.lt.s32.totalorder %s1396_s24, 31  ;;  %v2114_v16 = vmov (!%p1398_p4), 0.0  }
  0x89   : > { %431 = sbr.rel (%p1398_p4) target bundleno = 145 (0x91), region = 93  ;;  %432 = vst [vmem:[#allocation2] sm:$0xff] (!%p1398_p4), %v2114_v16  ;;  %433 = vst [vmem:[#allocation2 + $0x8] sm:$0xff] (!%p1398_p4), %v2114_v16 }
  0x8a   : > { %s2729_s24 = smov (!%p422_p0, %s1396_s24), 31  ;;  %434 = vst [vmem:[#allocation2 + $0x10] sm:$0xff] (!%p1398_p4), %v2114_v16  ;;  %435 = vst [vmem:[#allocation2 + $0x18] sm:$0xff] (!%p1398_p4), %v2114_v16 }
  0x8b   : > { %s1397_s16 = sshll.u32 %s2729_s24, 3  ;;  %436 = vst [vmem:[#allocation2 + $0x20] sm:$0xff] (!%p1398_p4), %v2114_v16  ;;  %437 = vst [vmem:[#allocation2 + $0x28] sm:$0xff] (!%p1398_p4), %v2114_v16 }
  0x8c   : > { %s2394_s14 = scalar_lea.vmem %s2679_s5, %s1397_s16  ;;  %438 = vst [vmem:[#allocation2 + $0x30] sm:$0xff] (!%p1398_p4), %v2114_v16  ;;  %439 = vst [vmem:[#allocation2 + $0x38] sm:$0xff] (!%p1398_p4), %v2114_v16 }
  0x8d   : > { %440 = vst [vmem:[#allocation2 + $0x40] sm:$0xff] (!%p1398_p4), %v2114_v16  ;;  %441 = vst [vmem:[#allocation2 + $0x48] sm:$0xff] (!%p1398_p4), %v2114_v16 }
  0x8e   : > { %442 = vst [vmem:[#allocation2 + $0x50] sm:$0xff] (!%p1398_p4), %v2114_v16  ;;  %443 = vst [vmem:[#allocation2 + $0x58] sm:$0xff] (!%p1398_p4), %v2114_v16 }
  0x8f   : > { %444 = vst [vmem:[#allocation2 + $0x60] sm:$0xff] (!%p1398_p4), %v2114_v16  ;;  %445 = vst [vmem:[#allocation2 + $0x68] sm:$0xff] (!%p1398_p4), %v2114_v16 }
  0x90   : > { %446 = vst [vmem:[#allocation2 + $0x70] sm:$0xff] %v2114_v16  ;;  %447 = vst [vmem:[#allocation2 + $0x78] sm:$0xff] %v2114_v16 }
  0x91 PF: > { %v1892_v17 = vld [vmem:[%s2377_s8] sm:$0xff]   ;;  %v1893_v18 = vld [vmem:[%s2377_s8 + $0x8] sm:$0xff]   ;;  %v1894_v19 = vld [vmem:[%s2377_s8 + $0x10] sm:$0xff]   ;;  %p1415_p2 = scmp.ne.s32.totalorder %s2092_s26, 1 }
  0x92   : > { %1540 = vmatprep.subr.bf16.mxu0 %v1892_v17  ;;  %1748 = vmatprep.subr.bf16.mxu1 %v1892_v17  ;;  %v1895_v20 = vld [vmem:[%s2377_s8 + $0x18] sm:$0xff]   ;;  %v1900_v21 = vld [vmem:[%s2375_s17] sm:$0xff]   ;;  %v1897_v24 = vld [vmem:[%s2377_s8 + $0x28] sm:$0xff]   ;;  %vm1239_vm0 = vcmask (!%p1415_p2), 261120  }
  0x93   : > { %1541 = vmatpush3.bf16.msra.mxu0 %v1892_v17  ;;  %1756 = vmatpush3.bf16.msra.mxu1 %v1892_v17  ;;  %v1901_v22 = vld [vmem:[%s2375_s17 + $0x20] sm:$0xff]   ;;  %v1898_v25 = vld [vmem:[%s2377_s8 + $0x30] sm:$0xff]   ;;  %v1899_v26 = vld [vmem:[%s2377_s8 + $0x38] sm:$0xff]  }
  0x94   : > { %1542 = vmatprep.subr.bf16.mxu0 %v1893_v18  ;;  %1749 = vmatprep.subr.bf16.mxu1 %v1893_v18  ;;  %v1896_v23 = vld [vmem:[%s2377_s8 + $0x20] sm:$0xff]   ;;  %v1902_v27 = vld [vmem:[%s2375_s17 + $0x8] sm:$0xff]   ;;  %v1904_v29 = vld [vmem:[%s2375_s17 + $0x10] sm:$0xff]  }
  0x95   : > { %1556 = vmatprep.mubr.bf16.mxu0 %v1900_v21  ;;  %1564 = vmatprep.mubr.bf16.mxu1 %v1901_v22  ;;  %v1903_v28 = vld [vmem:[%s2375_s17 + $0x28] sm:$0xff]   ;;  %v1905_v30 = vld [vmem:[%s2375_s17 + $0x30] sm:$0xff]   ;;  %v1906_v31 = vld [vmem:[%s2375_s17 + $0x18] sm:$0xff]  }
  0x96   : > { %v1907_v32 = vld [vmem:[%s2375_s17 + $0x38] sm:$0xff]   ;;  %v466_v33 = vld [vmem:[#allocation2 + $0x10] sm:$0xff]  ;;  %v464_v35 = vld [vmem:[#allocation2] sm:$0xff] }
  0x97   : > { %1543 = vmatpush3.bf16.msra.mxu0 %v1893_v18  ;;  %1757 = vmatpush3.bf16.msra.mxu1 %v1893_v18  ;;  %v474_v34 = vld [vmem:[#allocation2 + $0x50] sm:$0xff]  ;;  %v472_v36 = vld [vmem:[#allocation2 + $0x40] sm:$0xff]  ;;  %v467_v39 = vld [vmem:[#allocation2 + $0x18] sm:$0xff] }
  0x98   : > { %1544 = vmatprep.subr.bf16.mxu0 %v1894_v19  ;;  %1750 = vmatprep.subr.bf16.mxu1 %v1894_v19  ;;  %v475_v40 = vld [vmem:[#allocation2 + $0x58] sm:$0xff]  ;;  %v465_v45 = vld [vmem:[#allocation2 + $0x8] sm:$0xff]  ;;  %v470_v57 = vld [vmem:[#allocation2 + $0x30] sm:$0xff] }
  0x99   : > { %v473_v46 = vld [vmem:[#allocation2 + $0x48] sm:$0xff]  ;;  %v478_v58 = vld [vmem:[#allocation2 + $0x70] sm:$0xff]  ;;  %v468_v59 = vld [vmem:[#allocation2 + $0x20] sm:$0xff] }
  0x9a   : > { %v476_v60 = vld [vmem:[#allocation2 + $0x60] sm:$0xff]  ;;  %v471_v63 = vld [vmem:[#allocation2 + $0x38] sm:$0xff]  ;;  %v469_v5 = vld [vmem:[#allocation2 + $0x28] sm:$0xff] }
  0x9b   : > { %1545 = vmatpush3.bf16.msra.mxu0 %v1894_v19  ;;  %1758 = vmatpush3.bf16.msra.mxu1 %v1894_v19  ;;  %v479_v0 = vld [vmem:[#allocation2 + $0x78] sm:$0xff]  ;;  %v477_v6 = vld [vmem:[#allocation2 + $0x68] sm:$0xff]  ;;  %v805_v17 = vld [vmem:[%s2678_s4] sm:$0xff] (!%p1415_p2) }
  0x9c   : > { %1546 = vmatprep.subr.bf16.mxu0 %v1895_v20  ;;  %1751 = vmatprep.subr.bf16.mxu1 %v1895_v20  ;;  %v806_v18 = vld [vmem:[%s2678_s4 + $0x8] sm:$0xff] (!%p1415_p2)  ;;  %v789_v19 = vld [vmem:[%s2677_s3] sm:$0xff] (!%p1415_p2)  ;;  %v807_v22 = vld [vmem:[%s2678_s4 + $0x10] sm:$0xff] (!%p1415_p2) }
  0x9d   : > { %v790_v21 = vld [vmem:[%s2677_s3 + $0x8] sm:$0xff] (!%p1415_p2) }
  0x9f   : > { %1547 = vmatpush3.bf16.msra.mxu0 %v1895_v20  ;;  %1759 = vmatpush3.bf16.msra.mxu1 %v1895_v20  ;;  %v1684_v20 = vpack.c.bf16 (!%p1415_p2), %v806_v18, %v805_v17  ;;  %v803_v18 = vld [vmem:[%s2677_s3 + $0x70] sm:$0xff] (!%p1415_p2) }
  0xa0   : > { %1548 = vmatprep.subr.bf16.mxu0 %v1896_v23  ;;  %1752 = vmatprep.subr.bf16.mxu1 %v1896_v23 }
  0xa3   : > { %1549 = vmatpush3.bf16.msra.mxu0 %v1896_v23  ;;  %1760 = vmatpush3.bf16.msra.mxu1 %v1896_v23  ;;  %v808_v23 = vld [vmem:[%s2678_s4 + $0x18] sm:$0xff] (!%p1415_p2) }
  0xa4   : > { %1550 = vmatprep.subr.bf16.mxu0 %v1897_v24  ;;  %1753 = vmatprep.subr.bf16.mxu1 %v1897_v24 }
  0xa7   : > { %1551 = vmatpush3.bf16.msra.mxu0 %v1897_v24  ;;  %1761 = vmatpush3.bf16.msra.mxu1 %v1897_v24  ;;  %v2115_v24 = vmov (!%p1415_p2), 64  }
  0xa8   : > { %1552 = vmatprep.subr.bf16.mxu0 %v1898_v25  ;;  %1754 = vmatprep.subr.bf16.mxu1 %v1898_v25 }
  0xa9   : > { %1909 = vset.pattern.permute.xlu1 (!%p1415_p2), %v2115_v24  ;;  %1908 = vset.pattern.permute.xlu0 (!%p1415_p2), %v2115_v24 }
  0xab   : > { %1553 = vmatpush3.bf16.msra.mxu0 %v1898_v25  ;;  %1762 = vmatpush3.bf16.msra.mxu1 %v1898_v25  ;;  %v1716_v25 = vpack.c.bf16 (!%p1415_p2), %v790_v21, %v789_v19  ;;  %v804_v19 = vld [vmem:[%s2677_s3 + $0x78] sm:$0xff] (!%p1415_p2) }
  0xac   : > { %1554 = vmatprep.subr.bf16.mxu0 %v1899_v26  ;;  %1755 = vmatprep.subr.bf16.mxu1 %v1899_v26 }
  0xaf   : > { %1555 = vmatpush3.bf16.msra.mxu0 %v1899_v26  ;;  %1763 = vmatpush3.bf16.msra.mxu1 %v1899_v26  ;;  %v1688_v26 = vpack.c.bf16 (!%p1415_p2), %v808_v23, %v807_v22 }
  0xb0   : > { %1685 = vmatprep.subr.bf16.mxu1 (!%p1415_p2), %v1684_v20  ;;  %1717 = vmatprep.subr.bf16.mxu0 (!%p1415_p2), %v1716_v25 }
  0xb2   : > { %1557 = vmatmul.mubr.bf16.vlgmr.msra.gmra.mrb[0].mxu0 %v1902_v27  ;;  %1565 = vmatmul.mubr.bf16.vlgmr.msra.gmra.mrb[0].mxu1 %v1903_v28  ;;  %v791_v27 = vld [vmem:[%s2677_s3 + $0x10] sm:$0xff] (!%p1415_p2)  ;;  %v792_v28 = vld [vmem:[%s2677_s3 + $0x18] sm:$0xff] (!%p1415_p2) }
  0xb3   : > { %1560 = vmatprep.mubr.bf16.mxu0 %v1904_v29  ;;  %1568 = vmatprep.mubr.bf16.mxu1 %v1905_v30  ;;  %v809_v29 = vld [vmem:[%s2678_s4 + $0x20] sm:$0xff] (!%p1415_p2)  ;;  %v1720_v30 = vpack.c.bf16 (!%p1415_p2), %v792_v28, %v791_v27  ;;  %v1744_v28 = vpack.c.bf16 (!%p1415_p2), %v804_v19, %v803_v18 }
  0xb4   : > { %1687 = vmatpush3.bf16.msra.mxu1 (!%p1415_p2), %v1684_v20  ;;  %1719 = vmatpush3.bf16.msra.mxu0 (!%p1415_p2), %v1716_v25 }
  0xb5   : > { %1689 = vmatprep.subr.bf16.mxu1 (!%p1415_p2), %v1688_v26  ;;  %1721 = vmatprep.subr.bf16.mxu0 (!%p1415_p2), %v1720_v30 }
  0xb8   : > { %1691 = vmatpush3.bf16.msra.mxu1 (!%p1415_p2), %v1688_v26  ;;  %1723 = vmatpush3.bf16.msra.mxu0 (!%p1415_p2), %v1720_v30  ;;  %v1453_v26 = vld [vmem:[%s2384_s28 + $0x8] sm:$0xff] (!%p1415_p2)  }
  0xba   : > { %1561 = vmatmul.mubr.bf16.gmra.mrb[4].mxu0 %v1906_v31  ;;  %1569 = vmatmul.mubr.bf16.gmra.mrb[4].mxu1 %v1907_v32  ;;  %v810_v31 = vld [vmem:[%s2678_s4 + $0x28] sm:$0xff] (!%p1415_p2)  ;;  %v793_v32 = vld [vmem:[%s2677_s3 + $0x20] sm:$0xff] (!%p1415_p2) }
 0x185   : > { %v1558_v37 = vpop.f32.mrb[0].mxu0  ;;  %v1566_v38 = vpop.f32.mrb[0].mxu1 }
 0x186   : > { %v691_v41 = vadd.f32 %v1558_v37, %v466_v33  ;;  %v699_v42 = vadd.f32 %v1566_v38, %v474_v34  ;;  %v626_v43 = vpop.f32.mrb[1].mxu0  ;;  %v658_v44 = vpop.f32.mrb[1].mxu1  ;;  %v794_v33 = vld [vmem:[%s2677_s3 + $0x28] sm:$0xff] (!%p1415_p2)  ;;  %v1692_v34 = vpack.c.bf16 (!%p1415_p2), %v810_v31, %v809_v29  ;;  %v812_v37 = vld [vmem:[%s2678_s4 + $0x38] sm:$0xff] (!%p1415_p2)  ;;  %v795_v38 = vld [vmem:[%s2677_s3 + $0x30] sm:$0xff] (!%p1415_p2) }
 0x187   : > { %v689_v47 = vadd.f32 %v626_v43, %v464_v35  ;;  %v697_v48 = vadd.f32 %v658_v44, %v472_v36  ;;  %v1559_v49 = vpop.f32.mrb[2].mxu0  ;;  %v1567_v50 = vpop.f32.mrb[2].mxu1  ;;  %v1724_v35 = vpack.c.bf16 (!%p1415_p2), %v794_v33, %v793_v32  ;;  %v811_v36 = vld [vmem:[%s2678_s4 + $0x30] sm:$0xff] (!%p1415_p2)  ;;  %v797_v44 = vld [vmem:[%s2677_s3 + $0x40] sm:$0xff] (!%p1415_p2)  ;;  %v1427_v32 = vunpack.c.l.bf16 (!%p1415_p2), %v1453_v26 }
 0x188   : > { %707 = vst [vmem:[#allocation2 + $0x10] sm:$0xff] %v691_v41  ;;  %715 = vst [vmem:[#allocation2 + $0x50] sm:$0xff] %v699_v42  ;;  %v692_v51 = vadd.f32 %v1559_v49, %v467_v39  ;;  %v700_v52 = vadd.f32 %v1567_v50, %v475_v40  ;;  %v629_v53 = vpop.f32.mrb[3].mxu0  ;;  %v661_v54 = vpop.f32.mrb[3].mxu1  ;;  %v796_v39 = vld [vmem:[%s2677_s3 + $0x38] sm:$0xff] (!%p1415_p2)  ;;  %1693 = vmatprep.subr.bf16.mxu1 (!%p1415_p2), %v1692_v34  ;;  %v1696_v40 = vpack.c.bf16 (!%p1415_p2), %v812_v37, %v811_v36  ;;  %v813_v41 = vld [vmem:[%s2678_s4 + $0x40] sm:$0xff] (!%p1415_p2) }
 0x189   : > { %705 = vst [vmem:[#allocation2] sm:$0xff] %v689_v47  ;;  %713 = vst [vmem:[#allocation2 + $0x40] sm:$0xff] %v697_v48  ;;  %v690_v55 = vadd.f32 %v629_v53, %v465_v45  ;;  %v698_v56 = vadd.f32 %v661_v54, %v473_v46  ;;  %v814_v42 = vld [vmem:[%s2678_s4 + $0x48] sm:$0xff] (!%p1415_p2)  ;;  %1725 = vmatprep.subr.bf16.mxu0 (!%p1415_p2), %v1724_v35  ;;  %v1728_v43 = vpack.c.bf16 (!%p1415_p2), %v796_v39, %v795_v38  ;;  %v2475_v47 = vld [vmem:[%s2384_s28] sm:$0xff] (!%p1415_p2)  }
 0x18a   : > { %708 = vst [vmem:[#allocation2 + $0x18] sm:$0xff] %v692_v51  ;;  %716 = vst [vmem:[#allocation2 + $0x58] sm:$0xff] %v700_v52  ;;  %v798_v45 = vld [vmem:[%s2677_s3 + $0x48] sm:$0xff] (!%p1415_p2)  ;;  %1695 = vmatpush3.bf16.msra.mxu1 (!%p1415_p2), %v1692_v34  ;;  %v1423_v51 = vunpack.c.l.bf16 (!%p1415_p2), %v2475_v47  ;;  %1727 = vmatpush3.bf16.msra.mxu0 (!%p1415_p2), %v1724_v35  ;;  %v1424_v30 = vunpack.c.h.bf16 (!%p1415_p2), %v2475_v47  ;;  %v1454_v36 = vld [vmem:[%s2384_s28 + $0x10] sm:$0xff] (!%p1415_p2)  }
 0x18b   : > { %706 = vst [vmem:[#allocation2 + $0x8] sm:$0xff] %v690_v55  ;;  %714 = vst [vmem:[#allocation2 + $0x48] sm:$0xff] %v698_v56  ;;  %1697 = vmatprep.subr.bf16.mxu1 (!%p1415_p2), %v1696_v40  ;;  %v1700_v55 = vpack.c.bf16 (!%p1415_p2), %v814_v42, %v813_v41  ;;  %1729 = vmatprep.subr.bf16.mxu0 (!%p1415_p2), %v1728_v43 }
 0x18d   : > { %v1562_v61 = vpop.f32.mrb[4].mxu0  ;;  %v1570_v62 = vpop.f32.mrb[4].mxu1  ;;  %724 = sbr.rel (%p1415_p2) target bundleno = 664 (0x298), region = 97 }
 0x18e   : > { %v695_v1 = vadd.f32 %v1562_v61, %v470_v57  ;;  %v703_v2 = vadd.f32 %v1570_v62, %v478_v58  ;;  %v642_v3 = vpop.f32.mrb[5].mxu0  ;;  %v674_v4 = vpop.f32.mrb[5].mxu1  ;;  %v1732_v57 = vpack.c.bf16 (!%p1415_p2), %v798_v45, %v797_v44  ;;  %v815_v58 = vld [vmem:[%s2678_s4 + $0x50] sm:$0xff] (!%p1415_p2)  ;;  %1699 = vmatpush3.bf16.msra.mxu1 (!%p1415_p2), %v1696_v40  ;;  %1731 = vmatpush3.bf16.msra.mxu0 (!%p1415_p2), %v1728_v43  ;;  %v1428_v40 = vunpack.c.h.bf16 (!%p1415_p2), %v1453_v26 }
 0x18f   : > { %v693_v7 = vadd.f32 %v642_v3, %v468_v59  ;;  %v701_v8 = vadd.f32 %v674_v4, %v476_v60  ;;  %v1563_v9 = vpop.f32.mrb[6].mxu0  ;;  %v1571_v10 = vpop.f32.mrb[6].mxu1  ;;  %v2479_v50 = vld [vmem:[#allocation2 + $0x10] sm:$0xff] (!%p1415_p2)  ;;  %v816_v59 = vld [vmem:[%s2678_s4 + $0x58] sm:$0xff] (!%p1415_p2)  ;;  %1701 = vmatprep.subr.bf16.mxu1 (!%p1415_p2), %v1700_v55  ;;  %v1431_v43 = vunpack.c.l.bf16 (!%p1415_p2), %v1454_v36 }
 0x190   : > { %711 = vst [vmem:[#allocation2 + $0x30] sm:$0xff] %v695_v1  ;;  %719 = vst [vmem:[#allocation2 + $0x70] sm:$0xff] %v703_v2  ;;  %v696_v11 = vadd.f32 %v1563_v9, %v471_v63  ;;  %v704_v12 = vadd.f32 %v1571_v10, %v479_v0  ;;  %v645_v13 = vpop.f32.mrb[7].mxu0  ;;  %v677_v14 = vpop.f32.mrb[7].mxu1  ;;  %v725_v46 = vld [vmem:[#allocation2] sm:$0xff] (!%p1415_p2)  ;;  %v1113_v53 = vmax.f32 (!%p1415_p2), %v2479_v50, 1.0  ;;  %v1704_v2 = vpack.c.bf16 (!%p1415_p2), %v816_v59, %v815_v58 }
 0x191   : > { %709 = vst [vmem:[#allocation2 + $0x20] sm:$0xff] %v693_v7  ;;  %717 = vst [vmem:[#allocation2 + $0x60] sm:$0xff] %v701_v8  ;;  %v694_v15 = vadd.f32 %v645_v13, %v469_v5  ;;  %v702_v16 = vadd.f32 %v677_v14, %v477_v6  ;;  %v1111_v48 = vmax.f32 (!%p1415_p2), %v725_v46, 1.0  ;;  %1660 = vmatprep.mubr.f32.mxu0 (!%p1415_p2), %v725_v46  ;;  %v2484_v54 = vld [vmem:[#allocation2 + $0x18] sm:$0xff] (!%p1415_p2)  ;;  %v799_v62 = vld [vmem:[%s2677_s3 + $0x50] sm:$0xff] (!%p1415_p2)  ;;  %1733 = vmatprep.subr.bf16.mxu0 (!%p1415_p2), %v1732_v57 }
 0x192   : > { %712 = vst [vmem:[#allocation2 + $0x38] sm:$0xff] %v696_v11  ;;  %720 = vst [vmem:[#allocation2 + $0x78] sm:$0xff] %v704_v12  ;;  %v2477_v49 = vld [vmem:[#allocation2 + $0x8] sm:$0xff] (!%p1415_p2)  ;;  %v1114_v56 = vmax.f32 (!%p1415_p2), %v2484_v54, 1.0  ;;  %v773_v60 = vmul.f32 (!%p1415_p2), %v1423_v51, %v725_v46  ;;  %v800_v63 = vld [vmem:[%s2677_s3 + $0x58] sm:$0xff] (!%p1415_p2)  ;;  %1703 = vmatpush3.bf16.msra.mxu1 (!%p1415_p2), %v1700_v55  ;;  %1735 = vmatpush3.bf16.msra.mxu0 (!%p1415_p2), %v1732_v57  ;;  %v775_v42 = vmul.f32 (!%p1415_p2), %v1427_v32, %v2479_v50 }
 0x193   : > { %710 = vst [vmem:[#allocation2 + $0x28] sm:$0xff] %v694_v15  ;;  %718 = vst [vmem:[#allocation2 + $0x68] sm:$0xff] %v702_v16  ;;  %v1112_v52 = vmax.f32 (!%p1415_p2), %v2477_v49, 1.0  ;;  %1910 = vrsqrt.f32 (!%p1415_p2), %v1111_v48  ;;  %v1736_v4 = vpack.c.bf16 (!%p1415_p2), %v800_v63, %v799_v62  ;;  %v817_v5 = vld [vmem:[%s2678_s4 + $0x60] sm:$0xff] (!%p1415_p2)  ;;  %v818_v6 = vld [vmem:[%s2678_s4 + $0x68] sm:$0xff] (!%p1415_p2)  ;;  %1705 = vmatprep.subr.bf16.mxu1 (!%p1415_p2), %v1704_v2  ;;  %v774_v39 = vmul.f32 (!%p1415_p2), %v1424_v30, %v2477_v49 }
 0x194   : > { %1604 = vmatprep.mubr.f32.mxu1 %v773_v60  ;;  %v801_v7 = vld [vmem:[%s2677_s3 + $0x60] sm:$0xff]  ;;  %v802_v8 = vld [vmem:[%s2677_s3 + $0x68] sm:$0xff]  ;;  %v1708_v12 = vpack.c.bf16 %v818_v6, %v817_v5  ;;  %v819_v15 = vld [vmem:[%s2678_s4 + $0x70] sm:$0xff] }
 0x195   : > { %1912 = vrsqrt.f32 %v1112_v52  ;;  %1737 = vmatprep.subr.bf16.mxu0 %v1736_v4  ;;  %v1740_v14 = vpack.c.bf16 %v802_v8, %v801_v7  ;;  %v820_v16 = vld [vmem:[%s2678_s4 + $0x78] sm:$0xff]  ;;  %v2535_v20 = vld [vmem:[#allocation2 + $0x40] sm:$0xff]  ;;  %v2538_v23 = vld [vmem:[#allocation2 + $0x48] sm:$0xff]  ;;  %v776_v52 = vmul.f32 %v1428_v40, %v2484_v54 }
 0x196   : > { %1914 = vrsqrt.f32 %v1113_v53  ;;  %1707 = vmatpush3.bf16.msra.mxu1 %v1704_v2  ;;  %v1119_v22 = vmax.f32 %v2535_v20, 1.0  ;;  %1739 = vmatpush3.bf16.msra.mxu0 %v1736_v4  ;;  %v1712_v25 = vpack.c.bf16 %v820_v16, %v819_v15  ;;  %v1120_v27 = vmax.f32 %v2538_v23, 1.0  ;;  %v2543_v31 = vld [vmem:[#allocation2 + $0x50] sm:$0xff]  ;;  %v2546_v34 = vld [vmem:[#allocation2 + $0x58] sm:$0xff]  ;;  %v1456_v60 = vld [vmem:[%s2384_s28 + $0x20] sm:$0xff]  }
 0x197   : > { %1916 = vrsqrt.f32 %v1114_v56  ;;  %v2517_v9 = vld [vmem:[#allocation2 + $0x30] sm:$0xff]  ;;  %1709 = vmatprep.subr.bf16.mxu1 %v1708_v12  ;;  %1741 = vmatprep.subr.bf16.mxu0 %v1740_v14  ;;  %v1121_v33 = vmax.f32 %v2543_v31, 1.0  ;;  %v1122_v37 = vmax.f32 %v2546_v34, 1.0  ;;  %v1455_v46 = vld [vmem:[%s2384_s28 + $0x18] sm:$0xff]   ;;  %v1432_v53 = vunpack.c.h.bf16 %v1454_v36 }
 0x198   : > { %v2493_v61 = vld [vmem:[#allocation2 + $0x20] sm:$0xff]  ;;  %v1117_v10 = vmax.f32 %v2517_v9, 1.0  ;;  %v2560_v55 = vld [vmem:[#allocation2 + $0x70] sm:$0xff]  ;;  %v1435_v57 = vunpack.c.l.bf16 %v1455_v46  ;;  %v1436_v2 = vunpack.c.h.bf16 %v1455_v46  ;;  %v1439_v4 = vunpack.c.l.bf16 %v1456_v60 }
 0x199   : > { %v1115_v0 = vmax.f32 %v2493_v61, 1.0  ;;  %v2520_v11 = vld [vmem:[#allocation2 + $0x38] sm:$0xff]  ;;  %v2551_v41 = vld [vmem:[#allocation2 + $0x60] sm:$0xff]  ;;  %v777_v56 = vmul.f32 %v1431_v43, %v2493_v61  ;;  %v1125_v58 = vmax.f32 %v2560_v55, 1.0  ;;  %v1440_v8 = vunpack.c.h.bf16 %v1456_v60 }
 0x19a   : > { %v2502_v1 = vld [vmem:[#allocation2 + $0x28] sm:$0xff]  ;;  %v1118_v13 = vmax.f32 %v2520_v11, 1.0  ;;  %1711 = vmatpush3.bf16.msra.mxu1 %v1708_v12  ;;  %1743 = vmatpush3.bf16.msra.mxu0 %v1740_v14  ;;  %v1123_v44 = vmax.f32 %v2551_v41, 1.0  ;;  %v2565_v59 = vld [vmem:[#allocation2 + $0x78] sm:$0xff]  ;;  %v780_v7 = vmul.f32 %v1436_v2, %v2520_v11 }
 0x19b   : > { %v1116_v3 = vmax.f32 %v2502_v1, 1.0  ;;  %1918 = vrsqrt.f32 %v1115_v0  ;;  %1713 = vmatprep.subr.bf16.mxu1 %v1712_v25  ;;  %1745 = vmatprep.subr.bf16.mxu0 %v1744_v28  ;;  %v2555_v45 = vld [vmem:[#allocation2 + $0x68] sm:$0xff]  ;;  %v1126_v62 = vmax.f32 %v2565_v59, 1.0  ;;  %v778_v0 = vmul.f32 %v1432_v53, %v2502_v1 }
 0x19c   : > { %v1124_v47 = vmax.f32 %v2555_v45, 1.0  ;;  %v782_v14 = vmul.f32 %v1440_v8, %v2538_v23 }
 0x19d   : > { %1920 = vrsqrt.f32 %v1116_v3  ;;  %v1911_v17 = vpop.eup %1910  ;;  %v779_v3 = vmul.f32 %v1435_v57, %v2517_v9 }
 0x19e   : > { %1922 = vrsqrt.f32 %v1117_v10  ;;  %1145 = vperm.xlu0 %1908, %v1911_v17   ;;  %1715 = vmatpush3.bf16.msra.mxu1 %v1712_v25  ;;  %v1459_v17 = vld [vmem:[%s2384_s28 + $0x38] sm:$0xff]  }
 0x19f   : > { %v1913_v21 = vpop.eup %1912  ;;  %1924 = vrsqrt.f32 %v1118_v13  ;;  %1747 = vmatpush3.bf16.msra.mxu0 %v1744_v28 }
 0x1a0   : > { %v1915_v24 = vpop.eup %1914  ;;  %1926 = vrsqrt.f32 %v1119_v22  ;;  %v1451_v22 = vunpack.c.l.bf16 %v1459_v17 }
 0x1a1   : > { %1155 = vperm.xlu1 %1909, %v1915_v24   ;;  %v1917_v29 = vpop.eup %1916  ;;  %1928 = vrsqrt.f32 %v1120_v27  ;;  %1605 = vmatmul.mubr.f32.vlgmr.msra.gmra.mrb[0].mxu1 %v774_v39  ;;  %v1452_v24 = vunpack.c.h.bf16 %v1459_v17 }
 0x1a2   : > { %1150 = vperm.xlu0 %1908, %v1913_v21   ;;  %1930 = vrsqrt.f32 %v1121_v33  ;;  %1661 = vmatmul.mubr.f32.vlgmr.msra.gmra.mrb[0].mxu0 %v2477_v49  ;;  %v787_v25 = vmul.f32 %v1451_v22, %v2560_v55 }
 0x1a3   : > { %1932 = vrsqrt.f32 %v1122_v37  ;;  %1607 = vmatprep.mubr.f32.mxu1 %v775_v42  ;;  %1663 = vmatprep.mubr.f32.mxu0 %v2479_v50  ;;  %v1457_v50 = vld [vmem:[%s2384_s28 + $0x28] sm:$0xff]  }
 0x1a4   : > { %1934 = vrsqrt.f32 %v1123_v44  ;;  %v1443_v10 = vunpack.c.l.bf16 %v1457_v50  ;;  %v1444_v15 = vunpack.c.h.bf16 %v1457_v50 }
 0x1a5   : > { %v1919_v35 = vpop.eup %1918  ;;  %1160 = vperm.xlu1 %1909, %v1917_v29   ;;  %1936 = vrsqrt.f32 %v1124_v47  ;;  %1608 = vmatmul.mubr.f32.gmra.mrb[2].mxu1 %v776_v52 }
 0x1a6   : > { %1165 = vperm.xlu0 %1908, %v1919_v35   ;;  %1664 = vmatmul.mubr.f32.gmra.mrb[2].mxu0 %v2484_v54  ;;  %1938 = vrsqrt.f32 %v1125_v58  ;;  %v781_v54 = vmul.f32 %v1439_v4, %v2535_v20  ;;  %v784_v19 = vmul.f32 %v1444_v15, %v2546_v34 }
 0x1a7   : > { %v1921_v38 = vpop.eup %1920  ;;  %1610 = vmatprep.mubr.f32.mxu1 %v777_v56  ;;  %1666 = vmatprep.mubr.f32.mxu0 %v2493_v61  ;;  %1940 = vrsqrt.f32 %v1126_v62  ;;  %v1458_v61 = vld [vmem:[%s2384_s28 + $0x30] sm:$0xff]  }
 0x1a8   : > { %v1923_v48 = vpop.eup %1922  ;;  %v1447_v16 = vunpack.c.l.bf16 %v1458_v61  ;;  %v1448_v21 = vunpack.c.h.bf16 %v1458_v61 }
 0x1a9   : > { %1170 = vperm.xlu1 %1909, %v1921_v38   ;;  %v1925_v51 = vpop.eup %1924  ;;  %1611 = vmatmul.mubr.f32.gmra.mrb[4].mxu1 %v778_v0 }
 0x1aa   : > { %1175 = vperm.xlu0 %1908, %v1923_v48   ;;  %v1927_v63 = vpop.eup %1926  ;;  %1667 = vmatmul.mubr.f32.gmra.mrb[4].mxu0 %v2502_v1  ;;  %v783_v1 = vmul.f32 %v1443_v10, %v2543_v31 }
 0x1ab   : > { %v1929_v49 = vpop.eup %1928  ;;  %1613 = vmatprep.mubr.f32.mxu1 %v779_v3  ;;  %1669 = vmatprep.mubr.f32.mxu0 %v2517_v9 }
 0x1ac   : > { %v1931_v5 = vpop.eup %1930 }
 0x1ad   : > { %1180 = vperm.xlu1 %1909, %v1925_v51   ;;  %v1933_v6 = vpop.eup %1932  ;;  %1614 = vmatmul.mubr.f32.gmra.mrb[6].mxu1 %v780_v7 }
 0x1ae   : > { %1185 = vperm.xlu0 %1908, %v1927_v63   ;;  %v1935_v12 = vpop.eup %1934  ;;  %1670 = vmatmul.mubr.f32.gmra.mrb[6].mxu0 %v2520_v11  ;;  %v785_v11 = vmul.f32 %v1447_v16, %v2551_v41 }
 0x1af   : > { %v1937_v13 = vpop.eup %1936  ;;  %1616 = vmatprep.mubr.f32.mxu1 %v781_v54  ;;  %1672 = vmatprep.mubr.f32.mxu0 %v2535_v20  ;;  %v786_v20 = vmul.f32 %v1448_v21, %v2555_v45 }
 0x1b0   : > { %v1939_v9 = vpop.eup %1938 }
 0x1b1   : > { %1190 = vperm.xlu1 %1909, %v1929_v49   ;;  %v1941_v18 = vpop.eup %1940  ;;  %1617 = vmatmul.mubr.f32.gmra.mrb[8].mxu1 %v782_v14 }
 0x1b2   : > { %1195 = vperm.xlu0 %1908, %v1931_v5   ;;  %1673 = vmatmul.mubr.f32.gmra.mrb[8].mxu0 %v2538_v23  ;;  %v788_v23 = vmul.f32 %v1452_v24, %v2565_v59 }
 0x1b3   : > { %1619 = vmatprep.mubr.f32.mxu1 %v783_v1  ;;  %1675 = vmatprep.mubr.f32.mxu0 %v2543_v31 }
 0x1b5   : > { %1200 = vperm.xlu1 %1909, %v1933_v6   ;;  %1620 = vmatmul.mubr.f32.gmra.mrb[10].mxu1 %v784_v19 }
 0x1b6   : > { %1205 = vperm.xlu0 %1908, %v1935_v12   ;;  %1676 = vmatmul.mubr.f32.gmra.mrb[10].mxu0 %v2546_v34 }
 0x1b7   : > { %1622 = vmatprep.mubr.f32.mxu1 %v785_v11  ;;  %1678 = vmatprep.mubr.f32.mxu0 %v2551_v41 }
 0x1b9   : > { %1210 = vperm.xlu1 %1909, %v1937_v13   ;;  %1623 = vmatmul.mubr.f32.gmra.mrb[12].mxu1 %v786_v20 }
 0x1ba   : > { %1215 = vperm.xlu0 %1908, %v1939_v9   ;;  %1679 = vmatmul.mubr.f32.gmra.mrb[12].mxu0 %v2555_v45 }
 0x1bb   : > { %1625 = vmatprep.mubr.f32.mxu1 %v787_v25  ;;  %1681 = vmatprep.mubr.f32.mxu0 %v2560_v55 }
 0x1bd   : > { %1220 = vperm.xlu1 %1909, %v1941_v18   ;;  %1626 = vmatmul.mubr.f32.gmra.mrb[14].mxu1 %v788_v23 }
 0x1be   : > { %1682 = vmatmul.mubr.f32.gmra.mrb[14].mxu0 %v2565_v59 }
 0x21d   : > { %v1146_v27 = vpop.permute.xlu0 %1145 }
 0x220   : > { %v1156_v26 = vpop.permute.xlu1 %1155 }
 0x221   : > { %v1151_v29 = vpop.permute.xlu0 %1150 }
 0x224   : > { %v1161_v28 = vpop.permute.xlu1 %1160 }
 0x225   : > { %v1166_v34 = vpop.permute.xlu0 %1165 }
 0x228   : > { %v1171_v30 = vpop.permute.xlu1 %1170 }
 0x229   : > { %v1176_v47 = vpop.permute.xlu0 %1175 }
 0x22c   : > { %v1181_v43 = vpop.permute.xlu1 %1180 }
 0x22d   : > { %v1186_v2 = vpop.permute.xlu0 %1185 }
 0x230   : > { %v1191_v59 = vpop.permute.xlu1 %1190 }
 0x231   : > { %v1196_v14 = vpop.permute.xlu0 %1195 }
 0x234   : > { %v1201_v10 = vpop.permute.xlu1 %1200 }
 0x238   : > { %v1211_v11 = vpop.permute.xlu1 %1210 }
 0x274   : > { %v1606_v31 = vpop.f32.mrb[0].mxu1 }
 0x275   : > { %v1662_v32 = vpop.f32.mrb[0].mxu0  ;;  %v887_v33 = vpop.f32.mrb[1].mxu1 }
 0x276   : > { %v1038_v35 = vadd.f32 %v1662_v32, %v1606_v31  ;;  %v1032_v36 = vpop.f32.mrb[1].mxu0 }
 0x277   : > { %v1033_v37 = vadd.f32 %v1032_v36, %v887_v33 }
 0x278   : > { %v1224_v38 = vmul.f32 %v1151_v29, %v1038_v35  ;;  %v1609_v39 = vpop.f32.mrb[2].mxu1 }
 0x279   : > { %v1223_v40 = vmul.f32 %v1146_v27, %v1033_v37  ;;  %v1665_v41 = vpop.f32.mrb[2].mxu0  ;;  %v897_v42 = vpop.f32.mrb[3].mxu1 }
 0x27a   : > { %1241 = vst.msk [vmem:[%s2394_s14 + $0x8] sm:$0xff] %vm1239_vm0, %v1224_v38  ;;  %v1048_v44 = vadd.f32 %v1665_v41, %v1609_v39  ;;  %v1042_v45 = vpop.f32.mrb[3].mxu0  ;;  %v1221_v37 = vpop.permute.xlu1 %1220 }
 0x27b   : > { %1240 = vst.msk [vmem:[%s2394_s14] sm:$0xff] %vm1239_vm0, %v1223_v40  ;;  %v1043_v46 = vadd.f32 %v1042_v45, %v897_v42 }
 0x27c   : > { %v1226_v48 = vmul.f32 %v1161_v28, %v1048_v44  ;;  %v1612_v51 = vpop.f32.mrb[4].mxu1 }
 0x27d   : > { %v1225_v52 = vmul.f32 %v1156_v26, %v1043_v46  ;;  %v1668_v53 = vpop.f32.mrb[4].mxu0  ;;  %v907_v55 = vpop.f32.mrb[5].mxu1 }
 0x27e   : > { %1243 = vst.msk [vmem:[%s2394_s14 + $0x18] sm:$0xff] %vm1239_vm0, %v1226_v48  ;;  %v1058_v56 = vadd.f32 %v1668_v53, %v1612_v51  ;;  %v1052_v57 = vpop.f32.mrb[5].mxu0  ;;  %v1206_v26 = vpop.permute.xlu0 %1205 }
 0x27f   : > { %1242 = vst.msk [vmem:[%s2394_s14 + $0x10] sm:$0xff] %vm1239_vm0, %v1225_v52  ;;  %v1053_v58 = vadd.f32 %v1052_v57, %v907_v55 }
 0x280   : > { %v1228_v60 = vmul.f32 %v1171_v30, %v1058_v56  ;;  %v1615_v62 = vpop.f32.mrb[6].mxu1 }
 0x281   : > { %v1227_v63 = vmul.f32 %v1166_v34, %v1053_v58  ;;  %v1671_v49 = vpop.f32.mrb[6].mxu0  ;;  %v917_v0 = vpop.f32.mrb[7].mxu1 }
 0x282   : > { %1245 = vst.msk [vmem:[%s2394_s14 + $0x28] sm:$0xff] %vm1239_vm0, %v1228_v60  ;;  %v1068_v3 = vadd.f32 %v1671_v49, %v1615_v62  ;;  %v1062_v4 = vpop.f32.mrb[7].mxu0  ;;  %v1216_v39 = vpop.permute.xlu0 %1215 }
 0x283   : > { %1244 = vst.msk [vmem:[%s2394_s14 + $0x20] sm:$0xff] %vm1239_vm0, %v1227_v63  ;;  %v1063_v50 = vadd.f32 %v1062_v4, %v917_v0 }
 0x284   : > { %v1230_v5 = vmul.f32 %v1181_v43, %v1068_v3  ;;  %v1618_v6 = vpop.f32.mrb[8].mxu1 }
 0x285   : > { %v1229_v7 = vmul.f32 %v1176_v47, %v1063_v50  ;;  %v1674_v8 = vpop.f32.mrb[8].mxu0  ;;  %v927_v54 = vpop.f32.mrb[9].mxu1 }
 0x286   : > { %1247 = vst.msk [vmem:[%s2394_s14 + $0x38] sm:$0xff] %vm1239_vm0, %v1230_v5  ;;  %v1078_v61 = vadd.f32 %v1674_v8, %v1618_v6  ;;  %v1072_v12 = vpop.f32.mrb[9].mxu0 }
 0x287   : > { %1246 = vst.msk [vmem:[%s2394_s14 + $0x30] sm:$0xff] %vm1239_vm0, %v1229_v7  ;;  %v1073_v13 = vadd.f32 %v1072_v12, %v927_v54 }
 0x288   : > { %v1232_v15 = vmul.f32 %v1191_v59, %v1078_v61  ;;  %v1621_v1 = vpop.f32.mrb[10].mxu1 }
 0x289   : > { %v1231_v16 = vmul.f32 %v1186_v2, %v1073_v13  ;;  %v1677_v17 = vpop.f32.mrb[10].mxu0  ;;  %v937_v9 = vpop.f32.mrb[11].mxu1 }
 0x28a   : > { %1249 = vst.msk [vmem:[%s2394_s14 + $0x48] sm:$0xff] %vm1239_vm0, %v1232_v15  ;;  %v1088_v18 = vadd.f32 %v1677_v17, %v1621_v1  ;;  %v1082_v19 = vpop.f32.mrb[11].mxu0 }
 0x28b   : > { %1248 = vst.msk [vmem:[%s2394_s14 + $0x40] sm:$0xff] %vm1239_vm0, %v1231_v16  ;;  %v1083_v21 = vadd.f32 %v1082_v19, %v937_v9 }
 0x28c   : > { %v1234_v22 = vmul.f32 %v1201_v10, %v1088_v18  ;;  %v1624_v20 = vpop.f32.mrb[12].mxu1 }
 0x28d   : > { %v1233_v24 = vmul.f32 %v1196_v14, %v1083_v21  ;;  %v1680_v25 = vpop.f32.mrb[12].mxu0  ;;  %v947_v23 = vpop.f32.mrb[13].mxu1 }
 0x28e   : > { %1251 = vst.msk [vmem:[%s2394_s14 + $0x58] sm:$0xff] %vm1239_vm0, %v1234_v22  ;;  %v1098_v27 = vadd.f32 %v1680_v25, %v1624_v20  ;;  %v1092_v28 = vpop.f32.mrb[13].mxu0 }
 0x28f   : > { %1250 = vst.msk [vmem:[%s2394_s14 + $0x50] sm:$0xff] %vm1239_vm0, %v1233_v24  ;;  %v1093_v29 = vadd.f32 %v1092_v28, %v947_v23 }
 0x290   : > { %v1236_v30 = vmul.f32 %v1211_v11, %v1098_v27  ;;  %v1627_v31 = vpop.f32.mrb[14].mxu1 }
 0x291   : > { %v1235_v32 = vmul.f32 %v1206_v26, %v1093_v29  ;;  %v1683_v33 = vpop.f32.mrb[14].mxu0  ;;  %v957_v34 = vpop.f32.mrb[15].mxu1 }
 0x292   : > { %1253 = vst.msk [vmem:[%s2394_s14 + $0x68] sm:$0xff] %vm1239_vm0, %v1236_v30  ;;  %v1108_v35 = vadd.f32 %v1683_v33, %v1627_v31  ;;  %v1102_v36 = vpop.f32.mrb[15].mxu0 }
 0x293   : > { %1252 = vst.msk [vmem:[%s2394_s14 + $0x60] sm:$0xff] %vm1239_vm0, %v1235_v32  ;;  %v1103_v38 = vadd.f32 %v1102_v36, %v957_v34 }
 0x294   : > { %v1238_v40 = vmul.f32 %v1221_v37, %v1108_v35 }
 0x295   : > { %v1237_v41 = vmul.f32 %v1216_v39, %v1103_v38 }
 0x296   : > { %1255 = vst.msk [vmem:[%s2394_s14 + $0x78] sm:$0xff] %vm1239_vm0, %v1238_v40 }
 0x297   : > { %1254 = vst.msk [vmem:[%s2394_s14 + $0x70] sm:$0xff] %vm1239_vm0, %v1237_v41 }
 0x298 PF: > { %s21_s30 = sadd.s32 1, %s2108_s30   ;;  %s2706_s15 = sld [smem:[#allocation10_spill]] }
 0x299   : > { %p2630_p5 = scmp.ge.s32.totalorder %s21_s30, 6   ;;  %s2707_s23 = sld [smem:[#allocation15_spill]] }
 0x29a   : > { %s2708_s24 = sld [smem:[#allocation11_spill]]  ;;  %s2709_s25 = sld [smem:[#allocation16_spill]] }
 0x29b   : > { %s2710_s26 = sld [smem:[#allocation12_spill]]  ;;  %s2711_s17 = sld [smem:[#allocation13_spill]] }
 0x29c   : > { %s2712_s14 = sld [smem:[#allocation14_spill]]  ;;  %s2714_s18 = smov %s2064_s19 }
 0x29d   : > { %s2715_s19 = smov %s2068_s20  ;;  %s2716_s20 = smov %s2256_s13 }
 0x29e   : > { %s2717_s21 = smov %s2076_s22  ;;  %s2718_s22 = smov %s2706_s15 }
 0x29f   : > { %s2719_s27 = smov %s2104_s29  ;;  %20 = sbr.rel (!%p2630_p5) target bundleno = 13 (0xd), region = 150 }
 0x2a1   : > { %s2720_s28 = smov %s2711_s17 }
 0x2a2   : > { %s2721_s29 = smov %s2712_s14 }
 0x2a6   :  { %1278 = vsyncpa [#allocation5], 1 }
 0x2a7   :  { %1280 = vsyncpa [#allocation5 + $0x1], 1 }
 0x2a8   :  { %1281 = vsyncpa [#allocation7], 1 }
 0x2a9   :  { %1283 = vsyncpa [#allocation7 + $0x1], 1 }

</bundles_post_ra>
